<compile_context>
chip_gen: v7x
topology: tpu7x:2x2x1
jax: 0.10.0
libtpu: 0.0.40
codegen_flags: <defaults>
</compile_context>

<pallas_src>
import functools
import math

import jax
import jax.numpy as jnp
from jax.experimental import pallas as pl
from jax.experimental.pallas import tpu as pltpu

_TM_MAX = 256         # row-tile cap for the matmul kernels
_K_FULL_MAX = 2048    # use a single full-K block (no k-loop) below this
_N_FULL_MAX = 2048    # use a single full-N block below this
_VMEM_LIMIT = 32 * 1024 * 1024   # safe on v5e/v6e/v7x


def _round_up(x, m):
    return (x + m - 1) // m * m


# ----------------------------------------------------------------------------
# Pallas kernels
# ----------------------------------------------------------------------------
@functools.lru_cache(maxsize=None)
def _mm_single_kernel(relu: bool, has_res: bool):
    """Single-shot matmul (full-K, full-N block) + bias [+ residual] [+ relu]."""

    def body(x_ref, w_ref, b_ref, *rest):
        if has_res:
            r_ref, o_ref = rest
        else:
            (o_ref,) = rest
        y = jnp.dot(x_ref[...], w_ref[...], preferred_element_type=jnp.float32)
        y = y + b_ref[...]
        if has_res:
            y = y + r_ref[...].astype(jnp.float32)
        if relu:
            y = jnp.maximum(y, 0.0)
        o_ref[...] = y.astype(o_ref.dtype)

    return body


@functools.lru_cache(maxsize=None)
def _mm_acc_kernel(relu: bool, has_res: bool):
    """K-tiled matmul with f32 accumulator scratch (fallback for large K/N)."""

    def body(x_ref, w_ref, b_ref, *rest):
        if has_res:
            r_ref, o_ref, acc_ref = rest
        else:
            o_ref, acc_ref = rest
        k = pl.program_id(2)

        @pl.when(k == 0)
        def _():
            acc_ref[...] = jnp.zeros_like(acc_ref)

        acc_ref[...] += jnp.dot(x_ref[...], w_ref[...],
                                preferred_element_type=jnp.float32)

        @pl.when(k == pl.num_programs(2) - 1)
        def _():
            y = acc_ref[...] + b_ref[...]
            if has_res:
                y = y + r_ref[...].astype(jnp.float32)
            if relu:
                y = jnp.maximum(y, 0.0)
            o_ref[...] = y.astype(o_ref.dtype)

    return body


def _conv3x3_kernel(x_ref, w_ref, b_ref, o_ref, *, H, W, C, d, relu):
    """3x3 dilated conv (stride 1, 'same' via pre-pad) for one image.

    x_ref : (1, H+2d, W+2d, C)  bf16 padded activation
    w_ref : (9*C, Cout)         bf16 weights (kh, kw, cin) row order, BN-folded
    b_ref : (1, Cout)           f32  BN bias
    o_ref : (H*W, Cout)
    The 9 dilated taps are gathered in VMEM (no HBM im2col).
    """
    img = x_ref[0]                                    # (H+2d, W+2d, C)
    slabs = []
    for kh in range(3):
        for kw in range(3):
            slabs.append(img[kh * d:kh * d + H, kw * d:kw * d + W, :])
    patches = jnp.concatenate(slabs, axis=-1)         # (H, W, 9C)
    patches = patches.reshape(H * W, 9 * C)
    y = jnp.dot(patches, w_ref[...], preferred_element_type=jnp.float32)
    y = y + b_ref[...]
    if relu:
        y = jnp.maximum(y, 0.0)
    o_ref[...] = y.astype(o_ref.dtype)


# ----------------------------------------------------------------------------
# Pallas wrappers
# ----------------------------------------------------------------------------
@functools.partial(jax.jit, static_argnames=("relu", "out_dtype"))
def matmul_bias(x, w, b, residual=None, *, relu, out_dtype):
    """y = [relu]((x @ w) + bias [+ residual]); x/w bf16, accumulation f32."""
    M, K = x.shape
    _, Nc = w.shape
    has_res = residual is not None

    # M is the only dim we ever pad (zero rows, sliced off afterwards).
    if M <= _TM_MAX:
        TM = _round_up(M, 8)
        Mp = TM
    else:
        TM = _TM_MAX
        Mp = _round_up(M, TM)
    pad_m = Mp - M
    xp = jnp.pad(x, ((0, pad_m), (0, 0))) if pad_m else x
    rp = None
    if has_res:
        rp = jnp.pad(residual, ((0, pad_m), (0, 0))) if pad_m else residual
    b2 = b.reshape(1, Nc)

    if K <= _K_FULL_MAX and Nc <= _N_FULL_MAX:
        # Single-shot path: full-K / full-N blocks -> no K/N padding, no k-loop,
        # no accumulator scratch.
        ins = [xp, w, b2]
        in_specs = [
            pl.BlockSpec((TM, K), lambda i: (i, 0)),
            pl.BlockSpec((K, Nc), lambda i: (0, 0)),
            pl.BlockSpec((1, Nc), lambda i: (0, 0)),
        ]
        if has_res:
            ins.append(rp)
            in_specs.append(pl.BlockSpec((TM, Nc), lambda i: (i, 0)))
        out = pl.pallas_call(
            _mm_single_kernel(relu, has_res),
            out_shape=jax.ShapeDtypeStruct((Mp, Nc), out_dtype),
            grid_spec=pltpu.PrefetchScalarGridSpec(
                num_scalar_prefetch=0,
                grid=(Mp // TM,),
                in_specs=in_specs,
                out_specs=pl.BlockSpec((TM, Nc), lambda i: (i, 0)),
            ),
            compiler_params=pltpu.CompilerParams(
                dimension_semantics=("parallel",),
                vmem_limit_bytes=_VMEM_LIMIT),
        )(*ins)
        return out[:M]

    # Fallback: tile N and K with an f32 accumulator (large layers only).
    TN, TK = 256, 512
    Np, Kp = _round_up(Nc, TN), _round_up(K, TK)
    xp2 = jnp.pad(xp, ((0, 0), (0, Kp - K)))
    wp = jnp.pad(w, ((0, Kp - K), (0, Np - Nc)))
    bp = jnp.pad(b2, ((0, 0), (0, Np - Nc)))
    ins = [xp2, wp, bp]
    in_specs = [
        pl.BlockSpec((TM, TK), lambda i, j, k: (i, k)),
        pl.BlockSpec((TK, TN), lambda i, j, k: (k, j)),
        pl.BlockSpec((1, TN), lambda i, j, k: (0, j)),
    ]
    if has_res:
        ins.append(jnp.pad(rp, ((0, 0), (0, Np - Nc))))
        in_specs.append(pl.BlockSpec((TM, TN), lambda i, j, k: (i, j)))
    out = pl.pallas_call(
        _mm_acc_kernel(relu, has_res),
        out_shape=jax.ShapeDtypeStruct((Mp, Np), out_dtype),
        grid_spec=pltpu.PrefetchScalarGridSpec(
            num_scalar_prefetch=0,
            grid=(Mp // TM, Np // TN, Kp // TK),
            in_specs=in_specs,
            out_specs=pl.BlockSpec((TM, TN), lambda i, j, k: (i, j)),
            scratch_shapes=[pltpu.VMEM((TM, TN), jnp.float32)],
        ),
        compiler_params=pltpu.CompilerParams(
            dimension_semantics=("parallel", "parallel", "arbitrary"),
            vmem_limit_bytes=_VMEM_LIMIT),
    )(*ins)
    return out[:M, :Nc]


@functools.partial(jax.jit, static_argnames=("dilation", "relu", "out_dtype"))
def conv3x3_dilated(x, w, b, *, dilation, relu, out_dtype):
    """3x3 conv, stride 1, padding=dilation, fused BN-bias (+relu). x: NHWC bf16."""
    N, H, W, C = x.shape
    Cout = w.shape[1]
    d = dilation
    Hp, Wp = H + 2 * d, W + 2 * d
    xp = jnp.pad(x, ((0, 0), (d, d), (d, d), (0, 0)))
    b2 = b.reshape(1, Cout)

    kern = functools.partial(_conv3x3_kernel, H=H, W=W, C=C, d=d, relu=relu)
    out = pl.pallas_call(
        kern,
        out_shape=jax.ShapeDtypeStruct((N * H * W, Cout), out_dtype),
        grid_spec=pltpu.PrefetchScalarGridSpec(
            num_scalar_prefetch=0,
            grid=(N,),
            in_specs=[
                pl.BlockSpec((1, Hp, Wp, C), lambda n: (n, 0, 0, 0)),
                pl.BlockSpec((9 * C, Cout), lambda n: (0, 0)),
                pl.BlockSpec((1, Cout), lambda n: (0, 0)),
            ],
            out_specs=pl.BlockSpec((H * W, Cout), lambda n: (n, 0)),
        ),
        compiler_params=pltpu.CompilerParams(
            dimension_semantics=("parallel",),
            vmem_limit_bytes=_VMEM_LIMIT),
    )(xp, w, b2)
    return out.reshape(N, H, W, Cout)


# ----------------------------------------------------------------------------
# BottleneckPad forward (Pallas path)
# ----------------------------------------------------------------------------
def bottleneck_pad_forward(x_nchw, p):
    """Mirrors BottleneckPad.forward. p holds BN-folded, bf16 weights."""
    stride, dil = p["stride"], p["dilation"]
    x = jnp.transpose(x_nchw, (0, 2, 3, 1)).astype(jnp.float32)   # NHWC f32
    N, H, W, Cin = x.shape
    xs = x[:, ::stride, ::stride, :] if stride > 1 else x
    Ho, Wo = xs.shape[1], xs.shape[2]
    M = N * Ho * Wo
    xs_bf = xs.astype(jnp.bfloat16).reshape(M, Cin)
    planes = p["w1"].shape[1]

    # conv1 (1x1, stride) + bn1 + relu
    h = matmul_bias(xs_bf, p["w1"], p["b1"], relu=True, out_dtype=jnp.bfloat16)
    h = h.reshape(N, Ho, Wo, planes)

    # conv2 (3x3, dilated) + bn2 + relu
    h = conv3x3_dilated(h, p["w2"], p["b2"], dilation=dil, relu=True,
                        out_dtype=jnp.bfloat16)

    # residual branch
    if "wd" in p:
        res = matmul_bias(xs_bf, p["wd"], p["bd"], relu=False,
                          out_dtype=jnp.float32)
    else:
        assert stride == 1 and Cin == 4 * planes, "identity residual shape"
        res = xs.reshape(M, Cin)                   # f32 identity residual

    # conv3 (1x1) + bn3 + residual add + relu
    out = matmul_bias(h.reshape(M, planes), p["w3"], p["b3"], res,
                      relu=True, out_dtype=jnp.float32)
    out = out.reshape(N, Ho, Wo, 4 * planes)
    return jnp.transpose(out, (0, 3, 1, 2))        # NCHW


# ----------------------------------------------------------------------------
# Parameters (synthetic, deterministic) + BN folding + pure-JAX reference
# ----------------------------------------------------------------------------
_EPS = 1e-5


def make_raw_params(key, *, inplanes, planes, stride, dilation, downsample):
    ks = jax.random.split(key, 8)

    def conv_w(k, cout, cin, ksz):
        fan = cin * ksz * ksz
        return jax.random.normal(k, (cout, cin, ksz, ksz),
                                 jnp.float32) / math.sqrt(fan)

    def bn(k, c):
        k1, k2, k3, k4 = jax.random.split(k, 4)
        gamma = 1.0 + 0.1 * jax.random.normal(k1, (c,), jnp.float32)
        beta = 0.1 * jax.random.normal(k2, (c,), jnp.float32)
        mean = 0.1 * jax.random.normal(k3, (c,), jnp.float32)
        var = 1.0 + jnp.abs(0.1 * jax.random.normal(k4, (c,), jnp.float32))
        return (gamma, beta, mean, var)

    raw = {"stride": stride, "dilation": dilation,
           "w1": conv_w(ks[0], planes, inplanes, 1), "bn1": bn(ks[1], planes),
           "w2": conv_w(ks[2], planes, planes, 3), "bn2": bn(ks[3], planes),
           "w3": conv_w(ks[4], 4 * planes, planes, 1),
           "bn3": bn(ks[5], 4 * planes)}
    if downsample:
        raw["wd"] = conv_w(ks[6], 4 * planes, inplanes, 1)
        raw["bnd"] = bn(ks[7], 4 * planes)
    return raw


def _fold_bn(w_oihw, bn):
    gamma, beta, mean, var = bn
    s = gamma / jnp.sqrt(var + _EPS)
    return w_oihw * s[:, None, None, None], beta - mean * s


def fuse_params(raw):
    """Fold BN scale into the (bf16) weights; biases stay f32."""
    p = {"stride": raw["stride"], "dilation": raw["dilation"]}
    w1, b1 = _fold_bn(raw["w1"], raw["bn1"])
    p["w1"] = w1[:, :, 0, 0].T.astype(jnp.bfloat16)           # (Cin, planes)
    p["b1"] = b1
    w2, b2 = _fold_bn(raw["w2"], raw["bn2"])
    p["w2"] = jnp.transpose(w2, (2, 3, 1, 0)).reshape(
        -1, w2.shape[0]).astype(jnp.bfloat16)                  # (9*planes, planes)
    p["b2"] = b2
    w3, b3 = _fold_bn(raw["w3"], raw["bn3"])
    p["w3"] = w3[:, :, 0, 0].T.astype(jnp.bfloat16)            # (planes, 4*planes)
    p["b3"] = b3
    if "wd" in raw:
        wd, bd = _fold_bn(raw["wd"], raw["bnd"])
        p["wd"] = wd[:, :, 0, 0].T.astype(jnp.bfloat16)
        p["bd"] = bd
    return p


def _conv_ref(x, w_oihw, stride=1, padding=0, dilation=1):
    return jax.lax.conv_general_dilated(
        x, jnp.transpose(w_oihw, (2, 3, 1, 0)),
        window_strides=(stride, stride),
        padding=[(padding, padding), (padding, padding)],
        rhs_dilation=(dilation, dilation),
        dimension_numbers=("NHWC", "HWIO", "NHWC"))


def bottleneck_ref(x_nchw, raw):
    """Pure-JAX f32 reference of BottleneckPad.forward (eval-mode BN)."""
    def bn(y, prm):
        g, b, m, v = prm
        return (y - m) / jnp.sqrt(v + _EPS) * g + b

    s, d = raw["stride"], raw["dilation"]
    x = jnp.transpose(x_nchw, (0, 2, 3, 1)).astype(jnp.float32)
    out = jax.nn.relu(bn(_conv_ref(x, raw["w1"], stride=s), raw["bn1"]))
    out = jax.nn.relu(bn(_conv_ref(out, raw["w2"], padding=d, dilation=d),
                         raw["bn2"]))
    out = bn(_conv_ref(out, raw["w3"]), raw["bn3"])
    if "wd" in raw:
        res = bn(_conv_ref(x, raw["wd"], stride=s), raw["bnd"])
    else:
        res = x
    out = jax.nn.relu(out + res)
    return jnp.transpose(out, (0, 3, 1, 2))


def _rel_err(a, b):
    return float(jnp.max(jnp.abs(a - b)) / (jnp.max(jnp.abs(b)) + 1e-6))


# ----------------------------------------------------------------------------
if __name__ == "__main__":
    key = jax.random.PRNGKey(0)
    kx, kpa, kpb = jax.random.split(key, 3)
    x = jax.random.normal(kx, (2, 64, 16, 16), dtype=jnp.float32)   # NCHW

    # Config A: stride-2 bottleneck with downsample (inplanes=64, planes=16).
    raw_a = make_raw_params(kpa, inplanes=64, planes=16, stride=2,
                            dilation=1, downsample=True)
    out_a = jax.block_until_ready(bottleneck_pad_forward(x, fuse_params(raw_a)))
    ref_a = bottleneck_ref(x, raw_a)
    assert out_a.shape == (2, 64, 8, 8), out_a.shape
    assert bool(jnp.all(jnp.isfinite(out_a)))
    assert _rel_err(out_a, ref_a) < 0.08, _rel_err(out_a, ref_a)

    # Config B: identity residual, dilation=2 (inplanes=64, planes=16, stride=1).
    raw_b = make_raw_params(kpb, inplanes=64, planes=16, stride=1,
                            dilation=2, downsample=False)
    out_b = jax.block_until_ready(bottleneck_pad_forward(x, fuse_params(raw_b)))
    ref_b = bottleneck_ref(x, raw_b)
    assert out_b.shape == (2, 64, 16, 16), out_b.shape
    assert bool(jnp.all(jnp.isfinite(out_b)))
    assert _rel_err(out_b, ref_b) < 0.08, _rel_err(out_b, ref_b)

    print("KERNEL_OK")
</pallas_src>

<mosaic_0001>
module attributes {stable_mosaic.version = 11 : i64} {
  func.func @body(%arg0: i32, %arg1: memref<128x64xbf16, #tpu.memory_space<vmem>>, %arg2: memref<64x16xbf16, #tpu.memory_space<vmem>>, %arg3: memref<1x16xf32, #tpu.memory_space<vmem>>, %arg4: memref<128x16xbf16, #tpu.memory_space<vmem>>) attributes {dimension_semantics = [#tpu.dimension_semantics<parallel>], iteration_bounds = array<i64: 1>, scalar_prefetch = 0 : i64, scratch_operands = 0 : i64, tpu.core_type = #tpu.core_type<tc>, window_params = [{transform_indices = @transform_0, window_bounds = array<i64: 128, 64>}, {pipeline_mode = #tpu.pipeline_mode<synchronous>, transform_indices = @transform_1, window_bounds = array<i64: 64, 16>}, {pipeline_mode = #tpu.pipeline_mode<synchronous>, transform_indices = @transform_2, window_bounds = array<i64: 1, 16>}, {transform_indices = @transform_3, window_bounds = array<i64: 128, 16>}]} {
    %c0 = arith.constant 0 : index
    %c0_0 = arith.constant 0 : index
    %0 = vector.load %arg1[%c0, %c0_0] : memref<128x64xbf16, #tpu.memory_space<vmem>>, vector<128x64xbf16>
    %c0_1 = arith.constant 0 : index
    %c0_2 = arith.constant 0 : index
    %1 = vector.load %arg2[%c0_1, %c0_2] : memref<64x16xbf16, #tpu.memory_space<vmem>>, vector<64x16xbf16>
    %cst = arith.constant dense<0.000000e+00> : vector<128x16xf32>
    %2 = tpu.matmul %0, %1, %cst {dimension_numbers = #tpu.dot_dimension_numbers<[1], [0], [0], [1], [0, 0, 1, 1], [], []>} : vector<128x64xbf16>, vector<64x16xbf16>, vector<128x16xf32> -> vector<128x16xf32>
    %c0_3 = arith.constant 0 : index
    %c0_4 = arith.constant 0 : index
    %3 = vector.load %arg3[%c0_3, %c0_4] : memref<1x16xf32, #tpu.memory_space<vmem>>, vector<1x16xf32>
    %4 = vector.broadcast %3 : vector<1x16xf32> to vector<128x16xf32>
    %5 = arith.addf %2, %4 : vector<128x16xf32>
    %cst_5 = arith.constant 0.000000e+00 : f32
    %6 = vector.broadcast %cst_5 : f32 to vector<128x16xf32>
    %7 = arith.maximumf %5, %6 : vector<128x16xf32>
    %8 = arith.truncf %7 : vector<128x16xf32> to vector<128x16xbf16>
    %c0_6 = arith.constant 0 : index
    %c0_7 = arith.constant 0 : index
    %9 = vector.load %arg4[%c0_6, %c0_7] : memref<128x16xbf16, #tpu.memory_space<vmem>>, vector<128x16xbf16>
    tpu.vector_store %arg4[%c0_6, %c0_7], %8 {strides = array<i32>} : memref<128x16xbf16, #tpu.memory_space<vmem>>, vector<128x16xbf16>,
    return
  }
  func.func @transform_0(%arg0: i32) -> (i32, i32) {
    %c0_i32 = arith.constant 0 : i32
    %c0_i32_0 = arith.constant 0 : i32
    return %arg0, %c0_i32 : i32, i32
  }
  func.func @transform_1(%arg0: i32) -> (i32, i32) {
    %c0_i32 = arith.constant 0 : i32
    %c0_i32_0 = arith.constant 0 : i32
    %c0_i32_1 = arith.constant 0 : i32
    return %c0_i32, %c0_i32_0 : i32, i32
  }
  func.func @transform_2(%arg0: i32) -> (i32, i32) {
    %c0_i32 = arith.constant 0 : i32
    %c0_i32_0 = arith.constant 0 : i32
    %c0_i32_1 = arith.constant 0 : i32
    return %c0_i32, %c0_i32_0 : i32, i32
  }
  func.func @transform_3(%arg0: i32) -> (i32, i32) {
    %c0_i32 = arith.constant 0 : i32
    %c0_i32_0 = arith.constant 0 : i32
    return %arg0, %c0_i32 : i32, i32
  }
}

</mosaic_0001>

<bundles_post_ra>
// kernel: matmul_bias.1
= control target key start
LH: loop header
LB: loop body
LE: loop exit
PB: predicated region body
PF: predicated region fallthrough
CT: control target
= control target key end

     0   :  { %vm110_vm0 = vcmask 523264   ;;  %vm312_vm1 = vcmask 125952   ;;  %s573_s1 = inlined_call_operand.vmem [shape: bf16[64,16], index: 1, kind: input, shape index: {}]   ;;  %s574_s0 = inlined_call_operand.vmem [shape: bf16[128,64], index: 0, kind: input, shape index: {}]   ;;  %s575_s2 = inlined_call_operand.vmem [shape: f32[1,16], index: 2, kind: input, shape index: {}]   ;;  %s576_s3 = inlined_call_operand.vmem [shape: bf16[128,16], index: 3, kind: output, shape index: {}]  }
   0x1   :  { %v430_v0 = vld [vmem:[%s573_s1] sm:$0xff]   ;;  %v431_v1 = vld [vmem:[%s573_s1 + $0x8] sm:$0xff]   ;;  %v432_v2 = vld [vmem:[%s573_s1 + $0x10] sm:$0xff]  }
   0x2   :  { %398 = vmatprep.subr.bf16.mxu0 %v430_v0  ;;  %422 = vmatprep.subr.bf16.mxu1 %v430_v0  ;;  %v434_v3 = vld [vmem:[%s574_s0] sm:$0xff]   ;;  %v433_v5 = vld [vmem:[%s573_s1 + $0x18] sm:$0xff]   ;;  %v436_v6 = vld [vmem:[%s574_s0 + $0x8] sm:$0xff]  }
   0x3   :  { %399 = vmatpush3.bf16.msra.mxu0 %v430_v0  ;;  %426 = vmatpush3.bf16.msra.mxu1 %v430_v0  ;;  %v435_v4 = vld [vmem:[%s574_s0 + $0x20] sm:$0xff]   ;;  %v437_v7 = vld [vmem:[%s574_s0 + $0x28] sm:$0xff]   ;;  %v438_v8 = vld [vmem:[%s574_s0 + $0x10] sm:$0xff]  }
   0x4   :  { %400 = vmatprep.subr.bf16.mxu0 %v431_v1  ;;  %423 = vmatprep.subr.bf16.mxu1 %v431_v1  ;;  %v439_v9 = vld [vmem:[%s574_s0 + $0x30] sm:$0xff]   ;;  %v440_v10 = vld [vmem:[%s574_s0 + $0x18] sm:$0xff]   ;;  %v333_v12 = vld [vmem:[%s575_s2] ss:$0 sm:$0xff] }
   0x5   :  { %406 = vmatprep.mubr.msk.bf16.mxu0 %vm110_vm0, %v434_v3  ;;  %414 = vmatprep.mubr.msk.bf16.mxu1 %vm110_vm0, %v435_v4  ;;  %v441_v11 = vld [vmem:[%s574_s0 + $0x38] sm:$0xff]  }
   0x7   :  { %401 = vmatpush3.bf16.msra.mxu0 %v431_v1  ;;  %427 = vmatpush3.bf16.msra.mxu1 %v431_v1 }
   0x8   :  { %402 = vmatprep.subr.bf16.mxu0 %v432_v2  ;;  %424 = vmatprep.subr.bf16.mxu1 %v432_v2 }
   0xb   :  { %403 = vmatpush3.bf16.msra.mxu0 %v432_v2  ;;  %428 = vmatpush3.bf16.msra.mxu1 %v432_v2 }
   0xc   :  { %404 = vmatprep.subr.bf16.mxu0 %v433_v5  ;;  %425 = vmatprep.subr.bf16.mxu1 %v433_v5 }
   0xf   :  { %405 = vmatpush3.bf16.msra.mxu0 %v433_v5  ;;  %429 = vmatpush3.bf16.msra.mxu1 %v433_v5 }
  0x12   :  { %407 = vmatmul.mubr.msk.bf16.vlgmr.msra.gmra.mrb[0].mxu0 %vm110_vm0, %v436_v6  ;;  %415 = vmatmul.mubr.msk.bf16.vlgmr.msra.gmra.mrb[0].mxu1 %vm110_vm0, %v437_v7 }
  0x13   :  { %410 = vmatprep.mubr.msk.bf16.mxu0 %vm110_vm0, %v438_v8  ;;  %418 = vmatprep.mubr.msk.bf16.mxu1 %vm110_vm0, %v439_v9 }
  0x1a   :  { %411 = vmatmul.mubr.msk.bf16.gmra.mrb[4].mxu0 %vm110_vm0, %v440_v10  ;;  %419 = vmatmul.mubr.msk.bf16.gmra.mrb[4].mxu1 %vm110_vm0, %v441_v11 }
  0xe5   :  { %v408_v13 = vpop.f32.mrb[0].mxu0  ;;  %v416_v14 = vpop.f32.mrb[0].mxu1 }
  0xe6   :  { %v178_v15 = vadd.f32 %v408_v13, %v333_v12  ;;  %v210_v16 = vadd.f32 %v416_v14, %v333_v12  ;;  %v169_v17 = vpop.f32.mrb[1].mxu0  ;;  %v201_v18 = vpop.f32.mrb[1].mxu1 }
  0xe7   :  { %v170_v19 = vadd.f32 %v333_v12, %v169_v17  ;;  %v202_v20 = vadd.f32 %v333_v12, %v201_v18  ;;  %v409_v21 = vpop.f32.mrb[2].mxu0  ;;  %v417_v22 = vpop.f32.mrb[2].mxu1 }
  0xe8   :  { %v234_v23 = vmax.f32 %v178_v15, 0.0  ;;  %v242_v24 = vmax.f32 %v210_v16, 0.0  ;;  %v181_v25 = vadd.f32 %v409_v21, %v333_v12  ;;  %v213_v26 = vadd.f32 %v417_v22, %v333_v12  ;;  %v172_v27 = vpop.f32.mrb[3].mxu0  ;;  %v204_v28 = vpop.f32.mrb[3].mxu1 }
  0xe9   :  { %v232_v29 = vmax.f32 %v170_v19, 0.0  ;;  %v240_v30 = vmax.f32 %v202_v20, 0.0  ;;  %v173_v31 = vadd.f32 %v333_v12, %v172_v27  ;;  %v205_v32 = vadd.f32 %v333_v12, %v204_v28 }
  0xea   :  { %v372_v33 = vpack.c.bf16 %v234_v23, %v234_v23  ;;  %v380_v34 = vpack.c.bf16 %v242_v24, %v242_v24  ;;  %v235_v35 = vmax.f32 %v181_v25, 0.0  ;;  %v243_v36 = vmax.f32 %v213_v26, 0.0 }
  0xeb   :  { %v370_v37 = vpack.c.bf16 %v232_v29, %v232_v29  ;;  %v378_v38 = vpack.c.bf16 %v240_v30, %v240_v30  ;;  %v233_v39 = vmax.f32 %v173_v31, 0.0  ;;  %v241_v40 = vmax.f32 %v205_v32, 0.0 }
  0xec   :  { %315 = vst.msk [vmem:[%s576_s3 + $0x8] sm:$0xf] %vm312_vm1, %v372_v33  ;;  %323 = vst.msk [vmem:[%s576_s3 + $0x28] sm:$0xf] %vm312_vm1, %v380_v34  ;;  %v373_v41 = vpack.c.bf16 %v235_v35, %v235_v35  ;;  %v381_v42 = vpack.c.bf16 %v243_v36, %v243_v36 }
  0xed   :  { %313 = vst.msk [vmem:[%s576_s3] sm:$0xf] %vm312_vm1, %v370_v37  ;;  %321 = vst.msk [vmem:[%s576_s3 + $0x20] sm:$0xf] %vm312_vm1, %v378_v38  ;;  %v371_v43 = vpack.c.bf16 %v233_v39, %v233_v39  ;;  %v379_v44 = vpack.c.bf16 %v241_v40, %v241_v40  ;;  %v412_v45 = vpop.f32.mrb[4].mxu0  ;;  %v420_v46 = vpop.f32.mrb[4].mxu1 }
  0xee   :  { %316 = vst.msk [vmem:[%s576_s3 + $0xc] sm:$0xf] %vm312_vm1, %v373_v41  ;;  %324 = vst.msk [vmem:[%s576_s3 + $0x2c] sm:$0xf] %vm312_vm1, %v381_v42  ;;  %v194_v47 = vadd.f32 %v412_v45, %v333_v12  ;;  %v226_v48 = vadd.f32 %v420_v46, %v333_v12  ;;  %v185_v49 = vpop.f32.mrb[5].mxu0  ;;  %v217_v50 = vpop.f32.mrb[5].mxu1 }
  0xef   :  { %314 = vst.msk [vmem:[%s576_s3 + $0x4] sm:$0xf] %vm312_vm1, %v371_v43  ;;  %322 = vst.msk [vmem:[%s576_s3 + $0x24] sm:$0xf] %vm312_vm1, %v379_v44  ;;  %v186_v51 = vadd.f32 %v333_v12, %v185_v49  ;;  %v218_v52 = vadd.f32 %v333_v12, %v217_v50  ;;  %v413_v53 = vpop.f32.mrb[6].mxu0  ;;  %v421_v54 = vpop.f32.mrb[6].mxu1 }
  0xf0   :  { %v238_v55 = vmax.f32 %v194_v47, 0.0  ;;  %v246_v56 = vmax.f32 %v226_v48, 0.0  ;;  %v197_v57 = vadd.f32 %v413_v53, %v333_v12  ;;  %v229_v58 = vadd.f32 %v421_v54, %v333_v12  ;;  %v188_v59 = vpop.f32.mrb[7].mxu0  ;;  %v220_v60 = vpop.f32.mrb[7].mxu1 }
  0xf1   :  { %v236_v61 = vmax.f32 %v186_v51, 0.0  ;;  %v244_v62 = vmax.f32 %v218_v52, 0.0  ;;  %v189_v63 = vadd.f32 %v333_v12, %v188_v59  ;;  %v221_v0 = vadd.f32 %v333_v12, %v220_v60 }
  0xf2   :  { %v376_v1 = vpack.c.bf16 %v238_v55, %v238_v55  ;;  %v384_v2 = vpack.c.bf16 %v246_v56, %v246_v56  ;;  %v239_v3 = vmax.f32 %v197_v57, 0.0  ;;  %v247_v4 = vmax.f32 %v229_v58, 0.0 }
  0xf3   :  { %v374_v5 = vpack.c.bf16 %v236_v61, %v236_v61  ;;  %v382_v6 = vpack.c.bf16 %v244_v62, %v244_v62  ;;  %v237_v7 = vmax.f32 %v189_v63, 0.0  ;;  %v245_v8 = vmax.f32 %v221_v0, 0.0 }
  0xf4   :  { %319 = vst.msk [vmem:[%s576_s3 + $0x18] sm:$0xf] %vm312_vm1, %v376_v1  ;;  %327 = vst.msk [vmem:[%s576_s3 + $0x38] sm:$0xf] %vm312_vm1, %v384_v2  ;;  %v377_v9 = vpack.c.bf16 %v239_v3, %v239_v3  ;;  %v385_v10 = vpack.c.bf16 %v247_v4, %v247_v4 }
  0xf5   :  { %317 = vst.msk [vmem:[%s576_s3 + $0x10] sm:$0xf] %vm312_vm1, %v374_v5  ;;  %325 = vst.msk [vmem:[%s576_s3 + $0x30] sm:$0xf] %vm312_vm1, %v382_v6  ;;  %v375_v11 = vpack.c.bf16 %v237_v7, %v237_v7  ;;  %v383_v12 = vpack.c.bf16 %v245_v8, %v245_v8 }
  0xf6   :  { %320 = vst.msk [vmem:[%s576_s3 + $0x1c] sm:$0xf] %vm312_vm1, %v377_v9  ;;  %328 = vst.msk [vmem:[%s576_s3 + $0x3c] sm:$0xf] %vm312_vm1, %v385_v10 }
  0xf7   :  { %318 = vst.msk [vmem:[%s576_s3 + $0x14] sm:$0xf] %vm312_vm1, %v375_v11  ;;  %326 = vst.msk [vmem:[%s576_s3 + $0x34] sm:$0xf] %vm312_vm1, %v383_v12 }

</bundles_post_ra>
